<compile_context>
chip_gen: v5e
topology: v5e:2x2
jax: 0.10.0
libtpu: 0.0.40
codegen_flags: <defaults>
</compile_context>

<pallas_src>
import functools
import math

import jax
import jax.numpy as jnp
from jax import lax
from jax.experimental import pallas as pl
from jax.experimental.pallas import tpu as pltpu


# ---------------------------------------------------------------------------
# Capability probing (failure-proof; falls back to safe defaults).
# ---------------------------------------------------------------------------
def _vmem_capacity_bytes() -> int:
    try:
        return int(pltpu.get_tpu_info().vmem_capacity_bytes)
    except Exception:
        return 64 * 1024 * 1024          # conservative: v7x per-core VMEM


_VMEM_CAP = _vmem_capacity_bytes()
# Explicit scoped-VMEM limit (default is only 16/32 MiB); leave headroom for
# Mosaic-internal scratch and never exceed ~112 MiB.
_VMEM_LIMIT = max(32 * 1024 * 1024,
                  min(_VMEM_CAP - 8 * 1024 * 1024, 112 * 1024 * 1024))


def _probe_single_buffering():
    """pl.Buffered(1) halves VMEM for blocks whose index_map is constant
    (resident weights).  Probe once so we degrade gracefully if this jax
    version rejects single buffering."""
    try:
        mode = pl.Buffered(1)

        def _copy(x_ref, o_ref):
            o_ref[...] = x_ref[...]

        pl.pallas_call(
            _copy,
            out_shape=jax.ShapeDtypeStruct((8, 128), jnp.float32),
            grid=(1,),
            in_specs=[pl.BlockSpec((8, 128), lambda i: (0, 0),
                                   pipeline_mode=mode)],
            out_specs=pl.BlockSpec((8, 128), lambda i: (0, 0)),
        )(jnp.zeros((8, 128), jnp.float32))
        return mode
    except Exception:
        return None


_RESIDENT_MODE = _probe_single_buffering()


def _spec(block_shape, index_map, *, resident=False):
    """BlockSpec; single-buffered when the block is grid-invariant and the
    installed jax supports pipeline_mode=pl.Buffered(1)."""
    if resident and _RESIDENT_MODE is not None:
        return pl.BlockSpec(block_shape, index_map, pipeline_mode=_RESIDENT_MODE)
    return pl.BlockSpec(block_shape, index_map)


# ---------------------------------------------------------------------------
# Tiling heuristics.
# ---------------------------------------------------------------------------
def _choose_row_tile(n_rows: int, max_tile: int) -> int:
    """Row tile: multiple of 8, <= max_tile and (when there is enough work)
    small enough that the 'parallel' row axis has >= 2 steps (v7x megacore)."""
    t = min(max_tile, ((n_rows + 7) // 8) * 8)
    t = max(8, t - t % 8)
    if n_rows > 8:
        half = ((n_rows + 15) // 16) * 8        # ~ceil(n/2), multiple of 8
        t = min(t, half)
    return max(8, t)


def _choose_col_tile(embed_dim: int) -> int:
    """Column tile for the fused [E,3E] projection output: lane-aligned
    (multiple of 128) tiles that stay inside one q|k|v section; otherwise the
    full 3E width (small E)."""
    if embed_dim % 128 == 0:
        tc = min(embed_dim, 512)
        while embed_dim % tc:
            tc -= 128
        return tc
    return 3 * embed_dim


def _choose_head_group(num_heads: int, head_dim: int) -> int:
    """Heads per group so a group's lane width (gh*D) is a multiple of 128."""
    for gh in range(1, num_heads):
        if num_heads % gh == 0 and (gh * head_dim) % 128 == 0:
            return gh
    return num_heads


# ---------------------------------------------------------------------------
# Kernel 1: fused q|k|v projection + global-norm partial sums.
# ---------------------------------------------------------------------------
def qkv_proj_kernel(x_ref, w_ref, b_ref, qkv_ref, sq_ref, sk_ref, *,
                    embed_dim, n_q_col_tiles):
    """One wide bf16 MXU matmul (f32 accumulation) per (row-tile, col-tile),
    plus per-row-tile partial sums of squares of q and k (accumulated over the
    'arbitrary' column axis) for the global Frobenius norms."""
    j = pl.program_id(1)
    y = jnp.dot(x_ref[...], w_ref[...], preferred_element_type=jnp.float32)
    y = y + b_ref[...]
    qkv_ref[...] = y.astype(qkv_ref.dtype)

    @pl.when(j == 0)
    def _():
        sq_ref[...] = jnp.zeros_like(sq_ref)
        sk_ref[...] = jnp.zeros_like(sk_ref)

    if n_q_col_tiles == 0:
        # Single column step covering the whole q|k|v row.
        sq_ref[...] += jnp.sum(jnp.square(y[:, :embed_dim]))
        sk_ref[...] += jnp.sum(jnp.square(y[:, embed_dim:2 * embed_dim]))
    else:
        ssq = jnp.sum(jnp.square(y))

        @pl.when(j < n_q_col_tiles)
        def _():
            sq_ref[...] += ssq

        @pl.when(jnp.logical_and(j >= n_q_col_tiles, j < 2 * n_q_col_tiles))
        def _():
            sk_ref[...] += ssq


# ---------------------------------------------------------------------------
# Kernel 2: phi / den / normalized output, per (row-tile, head-group).
# ---------------------------------------------------------------------------
def phi_attention_kernel(*refs, embed_dim, split):
    """phi_q*phi_k fused as exp(Wq.q_hat + Wk.k_hat); den = per-head row sum of
    the phi products; num = den*v (the reference's [N,M,D] A1 intermediate is
    algebraically den (x) v and never materialized).  The constant scales
    exp(-1/2)/sqrt(M) cancel exactly between num and den and are dropped."""
    if split:
        q_ref, k_ref, v_ref, wq_ref, wk_ref, seg_ref, o_ref = refs
        q, k, v = q_ref[...], k_ref[...], v_ref[...]
    else:
        qkv_ref, wq_ref, wk_ref, seg_ref, o_ref = refs
        qkv = qkv_ref[...]
        q = qkv[:, :embed_dim]
        k = qkv[:, embed_dim:2 * embed_dim]
        v = qkv[:, 2 * embed_dim:]

    z = (jnp.dot(q, wq_ref[0], preferred_element_type=jnp.float32)
         + jnp.dot(k, wk_ref[0], preferred_element_type=jnp.float32))
    p = jnp.exp(z)                                            # [tn, GH*M] f32
    den = jnp.dot(p.astype(seg_ref.dtype), seg_ref[...],
                  preferred_element_type=jnp.float32)         # [tn, GH*D]
    num = den * v.astype(jnp.float32)
    o_ref[...] = (num * pl.reciprocal(den, approx=True)).astype(o_ref.dtype)


# ---------------------------------------------------------------------------
# Wrapper.
# ---------------------------------------------------------------------------
def kernelized_attention(x, wq, bq, wk, bk, wv, bv, pw, *, max_row_tile=None):
    """x: [B, S, E] -> [B, S, E].
    wq/wk/wv: [E, E] stored so that y = x @ W + b; biases: [E]; pw: [H, M, D]."""
    B, S, E = x.shape
    H, M, D = pw.shape
    assert H * D == E
    N = B * S
    f32, bf16 = jnp.float32, jnp.bfloat16

    if max_row_tile is None:
        # 512 hits ~85% of HBM roofline on v5e/v6e; keep smaller on v7x (64 MiB VMEM).
        max_row_tile = 512 if _VMEM_CAP >= 100 * 2 ** 20 else 384

    tn = _choose_row_tile(N, max_row_tile)
    nt = pl.cdiv(N, tn)
    n_pad = nt * tn

    tc = _choose_col_tile(E)
    ncol = (3 * E) // tc
    ncq = E // tc if ncol > 1 else 0          # column tiles per q/k section

    x2 = x.reshape(N, E)
    if n_pad != N:
        x2 = jnp.pad(x2, ((0, n_pad - N), (0, 0)))
    x2 = x2.astype(bf16)

    w_qkv = jnp.concatenate([wq, wk, wv], axis=1).astype(bf16)            # [E, 3E]
    b_qkv = jnp.concatenate([bq, bk, bv], axis=0).reshape(1, 3 * E).astype(f32)

    # ---- kernel 1: fused QKV projection (+ q/k sum-of-squares partials) -----
    qkv, sq_parts, sk_parts = pl.pallas_call(
        functools.partial(qkv_proj_kernel, embed_dim=E, n_q_col_tiles=ncq),
        out_shape=(
            jax.ShapeDtypeStruct((n_pad, 3 * E), bf16),
            jax.ShapeDtypeStruct((nt, 8, 128), f32),
            jax.ShapeDtypeStruct((nt, 8, 128), f32),
        ),
        grid_spec=pltpu.PrefetchScalarGridSpec(
            num_scalar_prefetch=0,
            grid=(nt, ncol),
            in_specs=[
                pl.BlockSpec((tn, E), lambda i, j: (i, 0)),               # x tile
                _spec((E, tc), lambda i, j: (0, j), resident=(ncol == 1)),  # weight
                _spec((1, tc), lambda i, j: (0, j), resident=(ncol == 1)),  # bias
            ],
            out_specs=[
                pl.BlockSpec((tn, tc), lambda i, j: (i, j)),              # q|k|v
                pl.BlockSpec((1, 8, 128), lambda i, j: (i, 0, 0)),        # ssq(q) partials
                pl.BlockSpec((1, 8, 128), lambda i, j: (i, 0, 0)),        # ssq(k) partials
            ],
        ),
        compiler_params=pltpu.CompilerParams(
            dimension_semantics=("parallel", "arbitrary"),
            vmem_limit_bytes=_VMEM_LIMIT),
    )(x2, w_qkv, b_qkv)

    # ---- global Frobenius norms from the per-tile partials ------------------
    # Padded rows contain exactly the bias (zero input rows); subtract their
    # contribution so the norms match the unpadded reference.
    pad_rows = n_pad - N
    ssq_q = jnp.sum(sq_parts[:, 0, 0]) - pad_rows * jnp.sum(jnp.square(bq.astype(f32)))
    ssq_k = jnp.sum(sk_parts[:, 0, 0]) - pad_rows * jnp.sum(jnp.square(bk.astype(f32)))
    inv_nq = lax.rsqrt(ssq_q)
    inv_nk = lax.rsqrt(ssq_k)

    # ---- head grouping for kernel 2 ------------------------------------------
    gh = _choose_head_group(H, D)
    gd = gh * D
    split = (gd % 128 == 0)      # lane-aligned per-group q/k/v column blocks
    if not split:
        gh, gd = H, E            # single group; load full q|k|v row and slice
    n_groups = H // gh

    # Per-group phi weights (head-block-diagonal inside a group), global
    # 1/||q|| and 1/||k|| folded in so kernel 2 needs no scalar plumbing.
    pw_t = pw.astype(f32).transpose(0, 2, 1).reshape(n_groups, gh, D, M)
    eye_g = jnp.eye(gh, dtype=f32)
    wg = jnp.einsum('gadm,ab->gadbm', pw_t, eye_g).reshape(n_groups, gd, gh * M)
    w_phi_q = (wg * inv_nq).astype(bf16)
    w_phi_k = (wg * inv_nk).astype(bf16)
    # Per-head segment-sum + broadcast matrix (0/1 -> exact in bf16).
    seg = jnp.kron(jnp.eye(gh, dtype=f32), jnp.ones((M, D), f32)).astype(bf16)

    if split:
        koff = E // gd
        data_specs = [
            pl.BlockSpec((tn, gd), lambda i, g: (i, g)),              # q block
            pl.BlockSpec((tn, gd), lambda i, g: (i, g + koff)),       # k block
            pl.BlockSpec((tn, gd), lambda i, g: (i, g + 2 * koff)),   # v block
        ]
        data_args = (qkv, qkv, qkv)
    else:
        data_specs = [pl.BlockSpec((tn, 3 * E), lambda i, g: (i, 0))]
        data_args = (qkv,)

    out = pl.pallas_call(
        functools.partial(phi_attention_kernel, embed_dim=E, split=split),
        out_shape=jax.ShapeDtypeStruct((n_pad, E), x.dtype),
        grid_spec=pltpu.PrefetchScalarGridSpec(
            num_scalar_prefetch=0,
            grid=(nt, n_groups),
            in_specs=data_specs + [
                pl.BlockSpec((1, gd, gh * M), lambda i, g: (g, 0, 0)),   # phi W (q)
                pl.BlockSpec((1, gd, gh * M), lambda i, g: (g, 0, 0)),   # phi W (k)
                _spec((gh * M, gd), lambda i, g: (0, 0), resident=True),  # seg-sum
            ],
            out_specs=pl.BlockSpec((tn, gd), lambda i, g: (i, g)),
        ),
        compiler_params=pltpu.CompilerParams(
            dimension_semantics=("parallel", "parallel"),
            vmem_limit_bytes=_VMEM_LIMIT),
    )(*data_args, w_phi_q, w_phi_k, seg)

    return out[:N].reshape(B, S, E).astype(x.dtype)


# ---------------------------------------------------------------------------
# Pure-JAX reference (mirrors the PyTorch forward, f32).
# ---------------------------------------------------------------------------
def reference(x, wq, bq, wk, bk, wv, bv, pw):
    B, S, E = x.shape
    H, M, D = pw.shape

    q = x @ wq + bq
    k = x @ wk + bk
    v = x @ wv + bv
    q = q.reshape(B, S, H, D)
    k = k.reshape(B, S, H, D)
    v = v.reshape(B, S, H, D)
    q = q / jnp.linalg.norm(q)
    k = k / jnp.linalg.norm(k)

    def phi(t):
        nrm = jnp.linalg.norm(t)
        out = jnp.exp(jnp.einsum('abc,deac->deab', pw, t))
        return out * jnp.exp(-nrm ** 2 / 2.0) / math.sqrt(M)

    phi_q = phi(q).transpose(0, 2, 1, 3)   # [B, H, S, M]
    phi_k = phi(k).transpose(0, 2, 1, 3)   # [B, H, S, M]
    v_t = v.transpose(0, 2, 1, 3)          # [B, H, S, D]

    a2 = phi_k
    a1 = jnp.einsum('...d,...e->...de', phi_k, v_t)        # [B, H, S, M, D]
    num = jnp.einsum('abcd,abcde->abce', phi_q, a1)         # [B, H, S, D]
    den = jnp.einsum('abcd,abcd->abc', phi_q, a2)[..., None]
    out = num / den
    return out.transpose(0, 2, 1, 3).reshape(B, S, E)


if __name__ == "__main__":
    # embedding_dim=32, num_heads=4, mapping_dim=None -> M = D = 8
    B, S, E, H = 2, 8, 32, 4
    D = E // H
    M = E // H

    key = jax.random.PRNGKey(0)
    ks = jax.random.split(key, 8)
    x = jax.random.normal(ks[0], (B, S, E), jnp.float32)
    wq = jax.random.normal(ks[1], (E, E), jnp.float32) * (1.0 / math.sqrt(E))
    bq = jax.random.normal(ks[2], (E,), jnp.float32) * 0.1
    wk = jax.random.normal(ks[3], (E, E), jnp.float32) * (1.0 / math.sqrt(E))
    bk = jax.random.normal(ks[4], (E,), jnp.float32) * 0.1
    wv = jax.random.normal(ks[5], (E, E), jnp.float32) * (1.0 / math.sqrt(E))
    bv = jax.random.normal(ks[6], (E,), jnp.float32) * 0.1
    pw = jax.random.normal(ks[7], (H, M, D), jnp.float32)  # torch.randn(H, M, D)

    fn = jax.jit(kernelized_attention)
    out = jax.block_until_ready(fn(x, wq, bq, wk, bk, wv, bv, pw))
    ref = reference(x, wq, bq, wk, bk, wv, bv, pw)

    assert out.shape == (B, S, E), out.shape
    err = float(jnp.max(jnp.abs(out - ref)))
    # bf16 MXU operands + approx reciprocal -> ~1e-2-level agreement expected.
    assert jnp.allclose(out, ref, rtol=3e-2, atol=3e-2), f"max abs err = {err}"

    print("KERNEL_OK")
</pallas_src>

<mosaic_0001>
module attributes {stable_mosaic.version = 11 : i64} {
  func.func @_copy(%arg0: i32, %arg1: memref<8x128xf32, #tpu.memory_space<vmem>>, %arg2: memref<8x128xf32, #tpu.memory_space<vmem>>) attributes {dimension_semantics = [#tpu.dimension_semantics<arbitrary>], iteration_bounds = array<i64: 1>, scalar_prefetch = 0 : i64, scratch_operands = 0 : i64, tpu.core_type = #tpu.core_type<tc>, window_params = [{pipeline_mode = #tpu.pipeline_mode<synchronous>, transform_indices = @transform_0, window_bounds = array<i64: 8, 128>}, {pipeline_mode = #tpu.pipeline_mode<synchronous>, transform_indices = @transform_1, window_bounds = array<i64: 8, 128>}]} {
    %c0 = arith.constant 0 : index
    %c0_0 = arith.constant 0 : index
    %0 = vector.load %arg1[%c0, %c0_0] : memref<8x128xf32, #tpu.memory_space<vmem>>, vector<8x128xf32>
    %c0_1 = arith.constant 0 : index
    %c0_2 = arith.constant 0 : index
    %1 = vector.load %arg2[%c0_1, %c0_2] : memref<8x128xf32, #tpu.memory_space<vmem>>, vector<8x128xf32>
    tpu.vector_store %arg2[%c0_1, %c0_2], %0 {strides = array<i32>} : memref<8x128xf32, #tpu.memory_space<vmem>>, vector<8x128xf32>,
    return
  }
  func.func @transform_0(%arg0: i32) -> (i32, i32) {
    %c0_i32 = arith.constant 0 : i32
    %c0_i32_0 = arith.constant 0 : i32
    %c0_i32_1 = arith.constant 0 : i32
    return %c0_i32, %c0_i32_0 : i32, i32
  }
  func.func @transform_1(%arg0: i32) -> (i32, i32) {
    %c0_i32 = arith.constant 0 : i32
    %c0_i32_0 = arith.constant 0 : i32
    %c0_i32_1 = arith.constant 0 : i32
    return %c0_i32, %c0_i32_0 : i32, i32
  }
}

module attributes {stable_mosaic.version = 11 : i64} {
  func.func @qkv_proj_kernel(%arg0: i32, %arg1: i32, %arg2: memref<8x32xbf16, #tpu.memory_space<vmem>>, %arg3: memref<32x96xbf16, #tpu.memory_space<vmem>>, %arg4: memref<1x96xf32, #tpu.memory_space<vmem>>, %arg5: memref<8x96xbf16, #tpu.memory_space<vmem>>, %arg6: memref<1x8x128xf32, #tpu.memory_space<vmem>>, %arg7: memref<1x8x128xf32, #tpu.memory_space<vmem>>) attributes {dimension_semantics = [#tpu.dimension_semantics<parallel>, #tpu.dimension_semantics<arbitrary>], iteration_bounds = array<i64: 2, 1>, scalar_prefetch = 0 : i64, scratch_operands = 0 : i64, tpu.core_type = #tpu.core_type<tc>, window_params = [{transform_indices = @transform_0, window_bounds = array<i64: 8, 32>}, {transform_indices = @transform_1, window_bounds = array<i64: 32, 96>}, {transform_indices = @transform_2, window_bounds = array<i64: 1, 96>}, {transform_indices = @transform_3, window_bounds = array<i64: 8, 96>}, {transform_indices = @transform_4, window_bounds = array<i64: 1, 8, 128>}, {transform_indices = @transform_5, window_bounds = array<i64: 1, 8, 128>}]} {
    %c0 = arith.constant 0 : index
    %c0_0 = arith.constant 0 : index
    %0 = vector.load %arg2[%c0, %c0_0] : memref<8x32xbf16, #tpu.memory_space<vmem>>, vector<8x32xbf16>
    %c0_1 = arith.constant 0 : index
    %c0_2 = arith.constant 0 : index
    %1 = vector.load %arg3[%c0_1, %c0_2] : memref<32x96xbf16, #tpu.memory_space<vmem>>, vector<32x96xbf16>
    %cst = arith.constant dense<0.000000e+00> : vector<8x96xf32>
    %2 = tpu.matmul %0, %1, %cst {dimension_numbers = #tpu.dot_dimension_numbers<[1], [0], [0], [1], [0, 0, 1, 1], [], []>} : vector<8x32xbf16>, vector<32x96xbf16>, vector<8x96xf32> -> vector<8x96xf32>
    %c0_3 = arith.constant 0 : index
    %c0_4 = arith.constant 0 : index
    %3 = vector.load %arg4[%c0_3, %c0_4] : memref<1x96xf32, #tpu.memory_space<vmem>>, vector<1x96xf32>
    %4 = vector.broadcast %3 : vector<1x96xf32> to vector<8x96xf32>
    %5 = arith.addf %2, %4 : vector<8x96xf32>
    %6 = arith.truncf %5 : vector<8x96xf32> to vector<8x96xbf16>
    %c0_5 = arith.constant 0 : index
    %c0_6 = arith.constant 0 : index
    %7 = vector.load %arg5[%c0_5, %c0_6] : memref<8x96xbf16, #tpu.memory_space<vmem>>, vector<8x96xbf16>
    tpu.vector_store %arg5[%c0_5, %c0_6], %6 {strides = array<i32>} : memref<8x96xbf16, #tpu.memory_space<vmem>>, vector<8x96xbf16>,
    %c0_i32 = arith.constant 0 : i32
    %8 = arith.cmpi eq, %arg1, %c0_i32 : i32
    %9 = arith.extui %8 : i1 to i32
    %c0_i32_7 = arith.constant 0 : i32
    %10 = arith.cmpi ne, %9, %c0_i32_7 : i32
    scf.if %10 {
      %cst_22 = arith.constant 0.000000e+00 : f32
      %31 = vector.broadcast %cst_22 : f32 to vector<1x8x128xf32>
      %c0_23 = arith.constant 0 : index
      %c0_24 = arith.constant 0 : index
      %c0_25 = arith.constant 0 : index
      %32 = vector.load %arg6[%c0_23, %c0_24, %c0_25] : memref<1x8x128xf32, #tpu.memory_space<vmem>>, vector<1x8x128xf32>
      tpu.vector_store %arg6[%c0_23, %c0_24, %c0_25], %31 {strides = array<i32>} : memref<1x8x128xf32, #tpu.memory_space<vmem>>, vector<1x8x128xf32>,
      %cst_26 = arith.constant 0.000000e+00 : f32
      %33 = vector.broadcast %cst_26 : f32 to vector<1x8x128xf32>
      %c0_27 = arith.constant 0 : index
      %c0_28 = arith.constant 0 : index
      %c0_29 = arith.constant 0 : index
      %34 = vector.load %arg7[%c0_27, %c0_28, %c0_29] : memref<1x8x128xf32, #tpu.memory_space<vmem>>, vector<1x8x128xf32>
      tpu.vector_store %arg7[%c0_27, %c0_28, %c0_29], %33 {strides = array<i32>} : memref<1x8x128xf32, #tpu.memory_space<vmem>>, vector<1x8x128xf32>,
    } else {
    }
    %c0_8 = arith.constant 0 : index
    %c0_9 = arith.constant 0 : index
    %c0_10 = arith.constant 0 : index
    %11 = vector.load %arg6[%c0_8, %c0_9, %c0_10] : memref<1x8x128xf32, #tpu.memory_space<vmem>>, vector<1x8x128xf32>
    %12 = vector.extract_strided_slice %5 {offsets = [0, 0], sizes = [8, 32], strides = [1, 1]} : vector<8x96xf32> to vector<8x32xf32>
    %13 = arith.mulf %12, %12 : vector<8x32xf32>
    %14 = vector.shape_cast %13 : vector<8x32xf32> to vector<1x8x32xf32>
    %cst_11 = arith.constant dense<0.000000e+00> : vector<1xf32>
    %15 = vector.multi_reduction <add>, %14, %cst_11 [1, 2] : vector<1x8x32xf32> to vector<1xf32>
    %16 = vector.shape_cast %15 : vector<1xf32> to vector<1x1x1xf32>
    %17 = vector.extract %16[0, 0, 0] : f32 from vector<1x1x1xf32>
    %18 = vector.broadcast %17 : f32 to vector<1x8x128xf32>
    %19 = arith.addf %11, %18 : vector<1x8x128xf32>
    %c0_12 = arith.constant 0 : index
    %c0_13 = arith.constant 0 : index
    %c0_14 = arith.constant 0 : index
    %20 = vector.load %arg6[%c0_12, %c0_13, %c0_14] : memref<1x8x128xf32, #tpu.memory_space<vmem>>, vector<1x8x128xf32>
    tpu.vector_store %arg6[%c0_12, %c0_13, %c0_14], %19 {strides = array<i32>} : memref<1x8x128xf32, #tpu.memory_space<vmem>>, vector<1x8x128xf32>,
    %c0_15 = arith.constant 0 : index
    %c0_16 = arith.constant 0 : index
    %c0_17 = arith.constant 0 : index
    %21 = vector.load %arg7[%c0_15, %c0_16, %c0_17] : memref<1x8x128xf32, #tpu.memory_space<vmem>>, vector<1x8x128xf32>
    %22 = vector.extract_strided_slice %5 {offsets = [0, 32], sizes = [8, 32], strides = [1, 1]} : vector<8x96xf32> to vector<8x32xf32>
    %23 = arith.mulf %22, %22 : vector<8x32xf32>
    %24 = vector.shape_cast %23 : vector<8x32xf32> to vector<1x8x32xf32>
    %cst_18 = arith.constant dense<0.000000e+00> : vector<1xf32>
    %25 = vector.multi_reduction <add>, %24, %cst_18 [1, 2] : vector<1x8x32xf32> to vector<1xf32>
    %26 = vector.shape_cast %25 : vector<1xf32> to vector<1x1x1xf32>
    %27 = vector.extract %26[0, 0, 0] : f32 from vector<1x1x1xf32>
    %28 = vector.broadcast %27 : f32 to vector<1x8x128xf32>
    %29 = arith.addf %21, %28 : vector<1x8x128xf32>
    %c0_19 = arith.constant 0 : index
    %c0_20 = arith.constant 0 : index
    %c0_21 = arith.constant 0 : index
    %30 = vector.load %arg7[%c0_19, %c0_20, %c0_21] : memref<1x8x128xf32, #tpu.memory_space<vmem>>, vector<1x8x128xf32>
    tpu.vector_store %arg7[%c0_19, %c0_20, %c0_21], %29 {strides = array<i32>} : memref<1x8x128xf32, #tpu.memory_space<vmem>>, vector<1x8x128xf32>,
    return
  }
  func.func @transform_0(%arg0: i32, %arg1: i32) -> (i32, i32) {
    %c0_i32 = arith.constant 0 : i32
    %c0_i32_0 = arith.constant 0 : i32
    return %arg0, %c0_i32 : i32, i32
  }
  func.func @transform_1(%arg0: i32, %arg1: i32) -> (i32, i32) {
    %c0_i32 = arith.constant 0 : i32
    %c0_i32_0 = arith.constant 0 : i32
    return %c0_i32, %arg1 : i32, i32
  }
  func.func @transform_2(%arg0: i32, %arg1: i32) -> (i32, i32) {
    %c0_i32 = arith.constant 0 : i32
    %c0_i32_0 = arith.constant 0 : i32
    return %c0_i32, %arg1 : i32, i32
  }
  func.func @transform_3(%arg0: i32, %arg1: i32) -> (i32, i32) {
    %c0_i32 = arith.constant 0 : i32
    return %arg0, %arg1 : i32, i32
  }
  func.func @transform_4(%arg0: i32, %arg1: i32) -> (i32, i32, i32) {
    %c0_i32 = arith.constant 0 : i32
    %c0_i32_0 = arith.constant 0 : i32
    %c0_i32_1 = arith.constant 0 : i32
    return %arg0, %c0_i32, %c0_i32_0 : i32, i32, i32
  }
  func.func @transform_5(%arg0: i32, %arg1: i32) -> (i32, i32, i32) {
    %c0_i32 = arith.constant 0 : i32
    %c0_i32_0 = arith.constant 0 : i32
    %c0_i32_1 = arith.constant 0 : i32
    return %arg0, %c0_i32, %c0_i32_0 : i32, i32, i32
  }
}

module attributes {stable_mosaic.version = 11 : i64} {
  func.func @phi_attention_kernel(%arg0: i32, %arg1: i32, %arg2: memref<8x96xbf16, #tpu.memory_space<vmem>>, %arg3: memref<1x32x32xbf16, #tpu.memory_space<vmem>>, %arg4: memref<1x32x32xbf16, #tpu.memory_space<vmem>>, %arg5: memref<32x32xbf16, #tpu.memory_space<vmem>>, %arg6: memref<8x32xf32, #tpu.memory_space<vmem>>) attributes {dimension_semantics = [#tpu.dimension_semantics<parallel>, #tpu.dimension_semantics<parallel>], iteration_bounds = array<i64: 2, 1>, scalar_prefetch = 0 : i64, scratch_operands = 0 : i64, tpu.core_type = #tpu.core_type<tc>, window_params = [{transform_indices = @transform_0, window_bounds = array<i64: 8, 96>}, {transform_indices = @transform_1, window_bounds = array<i64: 1, 32, 32>}, {transform_indices = @transform_2, window_bounds = array<i64: 1, 32, 32>}, {pipeline_mode = #tpu.pipeline_mode<synchronous>, transform_indices = @transform_3, window_bounds = array<i64: 32, 32>}, {transform_indices = @transform_4, window_bounds = array<i64: 8, 32>}]} {
    %c0 = arith.constant 0 : index
    %c0_0 = arith.constant 0 : index
    %0 = vector.load %arg2[%c0, %c0_0] : memref<8x96xbf16, #tpu.memory_space<vmem>>, vector<8x96xbf16>
    %1 = vector.extract_strided_slice %0 {offsets = [0, 0], sizes = [8, 32], strides = [1, 1]} : vector<8x96xbf16> to vector<8x32xbf16>
    %2 = vector.extract_strided_slice %0 {offsets = [0, 32], sizes = [8, 32], strides = [1, 1]} : vector<8x96xbf16> to vector<8x32xbf16>
    %3 = vector.extract_strided_slice %0 {offsets = [0, 64], sizes = [8, 32], strides = [1, 1]} : vector<8x96xbf16> to vector<8x32xbf16>
    %c0_1 = arith.constant 0 : index
    %c0_2 = arith.constant 0 : index
    %c0_3 = arith.constant 0 : index
    %4 = vector.load %arg3[%c0_1, %c0_2, %c0_3] : memref<1x32x32xbf16, #tpu.memory_space<vmem>>, vector<1x32x32xbf16>
    %5 = vector.shape_cast %4 : vector<1x32x32xbf16> to vector<32x32xbf16>
    %cst = arith.constant dense<0.000000e+00> : vector<8x32xf32>
    %6 = tpu.matmul %1, %5, %cst {dimension_numbers = #tpu.dot_dimension_numbers<[1], [0], [0], [1], [0, 0, 1, 1], [], []>} : vector<8x32xbf16>, vector<32x32xbf16>, vector<8x32xf32> -> vector<8x32xf32>
    %c0_4 = arith.constant 0 : index
    %c0_5 = arith.constant 0 : index
    %c0_6 = arith.constant 0 : index
    %7 = vector.load %arg4[%c0_4, %c0_5, %c0_6] : memref<1x32x32xbf16, #tpu.memory_space<vmem>>, vector<1x32x32xbf16>
    %8 = vector.shape_cast %7 : vector<1x32x32xbf16> to vector<32x32xbf16>
    %cst_7 = arith.constant dense<0.000000e+00> : vector<8x32xf32>
    %9 = tpu.matmul %2, %8, %cst_7 {dimension_numbers = #tpu.dot_dimension_numbers<[1], [0], [0], [1], [0, 0, 1, 1], [], []>} : vector<8x32xbf16>, vector<32x32xbf16>, vector<8x32xf32> -> vector<8x32xf32>
    %10 = arith.addf %6, %9 : vector<8x32xf32>
    %11 = math.exp %10 : vector<8x32xf32>
    %12 = arith.truncf %11 : vector<8x32xf32> to vector<8x32xbf16>
    %c0_8 = arith.constant 0 : index
    %c0_9 = arith.constant 0 : index
    %13 = vector.load %arg5[%c0_8, %c0_9] : memref<32x32xbf16, #tpu.memory_space<vmem>>, vector<32x32xbf16>
    %cst_10 = arith.constant dense<0.000000e+00> : vector<8x32xf32>
    %14 = tpu.matmul %12, %13, %cst_10 {dimension_numbers = #tpu.dot_dimension_numbers<[1], [0], [0], [1], [0, 0, 1, 1], [], []>} : vector<8x32xbf16>, vector<32x32xbf16>, vector<8x32xf32> -> vector<8x32xf32>
    %15 = arith.extf %3 : vector<8x32xbf16> to vector<8x32xf32>
    %16 = arith.mulf %14, %15 : vector<8x32xf32>
    %17 = tpu.reciprocal %14 {approx = true} : vector<8x32xf32> -> vector<8x32xf32>
    %18 = arith.mulf %16, %17 : vector<8x32xf32>
    %c0_11 = arith.constant 0 : index
    %c0_12 = arith.constant 0 : index
    %19 = vector.load %arg6[%c0_11, %c0_12] : memref<8x32xf32, #tpu.memory_space<vmem>>, vector<8x32xf32>
    tpu.vector_store %arg6[%c0_11, %c0_12], %18 {strides = array<i32>} : memref<8x32xf32, #tpu.memory_space<vmem>>, vector<8x32xf32>,
    return
  }
  func.func @transform_0(%arg0: i32, %arg1: i32) -> (i32, i32) {
    %c0_i32 = arith.constant 0 : i32
    %c0_i32_0 = arith.constant 0 : i32
    return %arg0, %c0_i32 : i32, i32
  }
  func.func @transform_1(%arg0: i32, %arg1: i32) -> (i32, i32, i32) {
    %c0_i32 = arith.constant 0 : i32
    %c0_i32_0 = arith.constant 0 : i32
    %c0_i32_1 = arith.constant 0 : i32
    return %arg1, %c0_i32, %c0_i32_0 : i32, i32, i32
  }
  func.func @transform_2(%arg0: i32, %arg1: i32) -> (i32, i32, i32) {
    %c0_i32 = arith.constant 0 : i32
    %c0_i32_0 = arith.constant 0 : i32
    %c0_i32_1 = arith.constant 0 : i32
    return %arg1, %c0_i32, %c0_i32_0 : i32, i32, i32
  }
  func.func @transform_3(%arg0: i32, %arg1: i32) -> (i32, i32) {
    %c0_i32 = arith.constant 0 : i32
    %c0_i32_0 = arith.constant 0 : i32
    %c0_i32_1 = arith.constant 0 : i32
    return %c0_i32, %c0_i32_0 : i32, i32
  }
  func.func @transform_4(%arg0: i32, %arg1: i32) -> (i32, i32) {
    %c0_i32 = arith.constant 0 : i32
    return %arg0, %arg1 : i32, i32
  }
}

</mosaic_0001>

<bundles_post_ra>
// kernel: tpu_custom_call.1
= control target key start
LH: loop header
LB: loop body
LE: loop exit
PB: predicated region body
PF: predicated region fallthrough
CT: control target
= control target key end

     0   :  { %6 = vsyncpa [#allocation3], 0  ;;  %s114_s0 = inlined_call_operand.hbm [shape: f32[8,128], index: 0, kind: input, shape index: {}]   ;;  %s115_s1 = inlined_call_operand.hbm [shape: f32[8,128], index: 1, kind: output, shape index: {}]  }
   0x1   :  { %7 = vsyncpa [#allocation4], 0  ;;  %s13_s8 = sshll.u32 %s114_s0, 4  ;;  %s96_s9 = smov [#allocation2]   ;;  %s14_s8 = int_to_ptr.hbm [resolvable:$true] %s13_s8 }
   0x2   :  { %s15_s10 = sshll.u32 %s96_s9, 4  ;;  %s16_s10 = int_to_ptr.vmem [resolvable:$true] %s15_s10 }
   0x3   :  { %18 = dma.hbm_to_vmem [thread:$0]  %s14_s8, 128, %s16_s10, [#allocation3]  }
   0x4   :  { %92 = dma.done.wait [#allocation3], 128  }
   0x5   :  { %93 = vsyncadd [#allocation3], 4294967168  ;;  %s97_s11 = smov [#allocation5]   ;;  %s32_s15 = sshll.u32 %s115_s1, 4  ;;  %v23_v0 = vld [vmem:[#allocation2] sm:$0xff]  ;;  %s33_s15 = int_to_ptr.hbm [resolvable:$true] %s32_s15 }
   0x6   :  { %s30_s12 = sshll.u32 %s97_s11, 4  ;;  %24 = vst [vmem:[#allocation5] sm:$0xff] %v23_v0  ;;  %s31_s12 = int_to_ptr.vmem [resolvable:$true] %s30_s12 }
   0x7   :  { %35 = dma.vmem_to_hbm [thread:$0]  %s31_s12, 128, %s33_s15, [#allocation4]  }
   0x8   :  { %94 = dma.done.wait [#allocation4], 128  }
   0x9   :  { %95 = vsyncadd [#allocation4], 4294967168 }
   0xa   :  { %40 = vsyncpa [#allocation3], 1 }
   0xb   :  { %41 = vsyncpa [#allocation4], 1 }

// kernel: kernelized_attention.2
= control target key start
LH: loop header
LB: loop body
LE: loop exit
PB: predicated region body
PF: predicated region fallthrough
CT: control target
= control target key end

     0   :  { %s644_s18 = smov 0   ;;  %s646_s19 = smov 0   ;;  %s699_s0 = inlined_call_operand.vmem [shape: bf16[16,32], index: 0, kind: input, shape index: {}]   ;;  %s700_s1 = inlined_call_operand.vmem [shape: bf16[32,96], index: 1, kind: input, shape index: {}]   ;;  %s701_s2 = inlined_call_operand.vmem [shape: f32[1,96], index: 2, kind: input, shape index: {}]   ;;  %s702_s3 = inlined_call_operand.vmem [shape: bf16[16,96], index: 3, kind: output, shape index: {0}]   ;;  %s703_s4 = inlined_call_operand.vmem [shape: f32[2,8,128], index: 4, kind: output, shape index: {1}]   ;;  %s704_s5 = inlined_call_operand.vmem [shape: f32[2,8,128], index: 5, kind: output, shape index: {2}]  }
   0x1   :  { %s648_s20 = smov 0  }
   0x2 LB: > { %s28_s21 = sadd.s32 1, %s607_s19  ;;  %p540_p0 = scmp.ge.s32.totalorder %s611_s20, 1  ;;  %s611_s20 = sphi %s648_s20, %s16_s20   ;;  %s607_s19 = sphi %s646_s19, %s706_s19   ;;  %s603_s18 = sphi %s644_s18, %s705_s18  }
   0x3   : > { %p30_p1 = scmp.ge.s32.totalorder %s28_s21, 2  ;;  %p222_p2 = scmp.lt.s32.totalorder %s611_s20, 3 }
   0x5   : > { %s708_s21 = smov (%p30_p1, %s28_s21), 0  ;;  %p223_p3 = pnand %p540_p0, %p222_p2 }
   0x6   : > { %p266_p4 = scmp.lt.s32.totalorder (!%p223_p3), %s603_s18, 1  ;;  %s613_s10 = smov (!%p223_p3), 96  }
   0x7   : > { %226 = sbr.rel (%p223_p3) target bundleno = 446 (0x1be), region = 32 }
   0xc   : > { %v557_v0 = vld [vmem:[%s700_s1 + $0x8] sm:$0xff]  ;;  %v556_v1 = vld [vmem:[%s700_s1] sm:$0xff]  ;;  %s710_s18 = smov (!%p266_p4, %s603_s18), 1  ;;  %vm314_vm0 = vcmask 261120   ;;  %vm332_vm1 = vcmask 781312  }
   0xd   : > { %324 = vmatpush.bf16.msra.mxu0 %v557_v0  ;;  %s541_s26 = sshll.u32 %s710_s18, 2  ;;  %v588_v3 = vld [vmem:[%s701_s2] ss:$0 sm:$0xff]  ;;  %s543_s11 = sshll.u32 %s710_s18, 3 }
   0xe   : > { %s269_s29 = scalar_lea.vmem %s699_s0, %s541_s26  ;;  %s283_s9 = scalar_lea.vmem %s702_s3, %s541_s26 }
   0xf   : > { %v293_v2 = vld [vmem:[%s269_s29] sm:$0xf]  ;;  %s287_s15 = scalar_lea.vmem %s703_s4, %s543_s11  ;;  %s291_s18 = scalar_lea.vmem %s704_s5, %s543_s11 }
  0x11   : > { %325 = vmatpush.bf16.msra.mxu0 %v556_v1 }
  0x14   : > { %553 = vmatmul.msk.bf16.vlgmr.msra.gmra.mxu0 %vm314_vm0, %v293_v2 }
  0x91   : > { %v327_v4 = vpop.f32.mrf.mxu0 }
  0x92   : > { %v328_v5 = vadd.f32 %v588_v3, %v327_v4 }
  0x94   : > { %v331_v6 = vpack.c.bf16 %v328_v5, %v328_v5  ;;  %v341_v7 = vmul.f32 %v328_v5, %v328_v5 }
  0x96   : > { %333 = vst.msk [vmem:[%s283_s9] sm:$0xf] %vm332_vm1, %v331_v6  ;;  %357 = vrot.lane.b32.xlu0 %v341_v7, %s613_s10  ;;  %v342_v9 = vsel %vm314_vm0, %v341_v7, 0.0 }
  0x99   : > { %v329_v8 = vpop.f32.mrf.mxu0 }
  0xc0   : > { %343 = vadd.xlane.f32.xlu0 %v342_v9 }
 0x108   : > { %v358_v10 = vpop.permute.xlu0 %357 }
 0x109   : > { %v360_v11 = vsel %vm314_vm0, %v358_v10, 0.0 }
 0x10a   : > { %361 = vadd.xlane.f32.xlu1 %v360_v11 }
 0x133   : > { %v344_v12 = vpop.xlane.xlu0 %343 }
 0x134   : > { %v345_v13 = vrot.slane %v344_v12, 4 }
 0x136   : > { %v346_v14 = vadd.f32 %v345_v13, %v344_v12 }
 0x138   : > { %v347_v15 = vrot.slane %v346_v14, 2 }
 0x13a   : > { %v348_v16 = vadd.f32 %v347_v15, %v346_v14 }
 0x13c   : > { %v349_v17 = vrot.slane %v348_v16, 1 }
 0x13e   : > { %v350_v18 = vadd.f32 %v349_v17, %v348_v16 }
 0x140   : > { %558 = vpush %v350_v18 }
 0x171   : > { %s559_s12 = spop %558 }
 0x172   : > { %v352_v19 = vstv %s559_s12 }
 0x173   : > { %354 = vst [vmem:[%s287_s15] sm:$0xff] %v352_v19 }
 0x17d   : > { %v362_v20 = vpop.xlane.xlu1 %361 }
 0x17e   : > { %v363_v21 = vrot.slane %v362_v20, 4 }
 0x180   : > { %v364_v22 = vadd.f32 %v363_v21, %v362_v20 }
 0x182   : > { %v365_v23 = vrot.slane %v364_v22, 2 }
 0x184   : > { %v366_v24 = vadd.f32 %v365_v23, %v364_v22 }
 0x186   : > { %v367_v25 = vrot.slane %v366_v24, 1 }
 0x188   : > { %v368_v26 = vadd.f32 %v367_v25, %v366_v24 }
 0x18a   : > { %560 = vpush %v368_v26 }
 0x1bb   : > { %s561_s16 = spop %560 }
 0x1bc   : > { %v370_v27 = vstv %s561_s16 }
 0x1bd   : > { %372 = vst [vmem:[%s291_s18] sm:$0xff] %v370_v27 }
 0x1be PF: > { %s16_s20 = sadd.s32 1, %s611_s20   ;;  %s705_s18 = smov %s607_s19 }
 0x1bf   : > { %p13_p5 = scmp.ge.s32.totalorder %s16_s20, 4   ;;  %s706_s19 = smov %s708_s21 }
 0x1c1   :  { %15 = sbr.rel (!%p13_p5) target bundleno = 2 (0x2), region = 96 }

// kernel: kernelized_attention.3
= control target key start
LH: loop header
LB: loop body
LE: loop exit
PB: predicated region body
PF: predicated region fallthrough
CT: control target
= control target key end

     0   :  { %9 = vsyncpa [#allocation3], 0  ;;  %s811_s0 = inlined_call_operand.vmem [shape: bf16[16,96], index: 0, kind: input, shape index: {}]   ;;  %s812_s1 = inlined_call_operand.vmem [shape: bf16[1,32,32], index: 1, kind: input, shape index: {}]   ;;  %s813_s2 = inlined_call_operand.vmem [shape: bf16[1,32,32], index: 2, kind: input, shape index: {}]   ;;  %s814_s3 = inlined_call_operand.vmem [shape: bf16[32,32], index: 3, kind: input, shape index: {}]   ;;  %s815_s4 = inlined_call_operand.hbm [shape: f32[16,32], index: 4, kind: output, shape index: {}]  }
   0x1   :  { %11 = vsyncpa [#allocation3 + $0x1], 0  ;;  %s692_s15 = smov 0   ;;  %s694_s16 = smov 0  }
   0x2   :  { %s696_s17 = smov 0   ;;  %s698_s18 = smov 0  }
   0x3   :  { %s700_s19 = smov 0   ;;  %s702_s20 = smov 0  }
   0x4 LB: > { %s478_s21 = sadd.s32 4294967295, %s663_s20   ;;  %s479_s22 = sadd.s32 4294967294, %s663_s20   ;;  %s663_s20 = sphi %s702_s20, %s17_s20   ;;  %s659_s19 = sphi %s700_s19, %s822_s19   ;;  %s655_s18 = sphi %s698_s18, %s821_s18   ;;  %s651_s17 = sphi %s696_s17, %s820_s17   ;;  %s647_s16 = sphi %s694_s16, %s819_s16   ;;  %s643_s15 = sphi %s692_s15, %s818_s15  }
   0x5   : > { %s29_s23 = sadd.s32 1, %s659_s19  ;;  %s137_s24 = sadd.s32 1, %s651_s17 }
   0x6   : > { %p31_p0 = scmp.ge.s32.totalorder %s29_s23, 2  ;;  %p147_p1 = scmp.ne.s32.totalorder %s651_s17, %s647_s16 }
   0x7   : > { %p148_p2 = scmp.eq.s32.totalorder %s478_s21, 1  ;;  %p153_p3 = scmp.ne.s32.totalorder %s647_s16, %s643_s15 }
   0x8   : > { %s824_s23 = smov (%p31_p0, %s29_s23), 0  ;;  %p154_p5 = scmp.eq.s32.totalorder %s479_s22, 1 }
   0x9   : > { %p732_p4 = por %p148_p2, %p147_p1  ;;  %s132_s26 = ssub.s32 %s659_s19, %s824_s23 }
   0xa   : > { %p484_p6 = scmp.ge.s32.totalorder %s663_s20, 1  ;;  %p135_p7 = scmp.eq.s32.totalorder %s132_s26, 0 }
   0xb   : > { %p739_p8 = por %p154_p5, %p153_p3  ;;  %p198_p9 = scmp.lt.s32.totalorder %s663_s20, 3 }
   0xc   : > { %s745_s28 = scalar_select %p135_p7, %s651_s17, %s137_s24  }
   0xd   : > { %p199_p10 = pnand %p484_p6, %p198_p9 }
   0xe   : > { %p233_p11 = scmp.lt.s32.totalorder (!%p199_p10), %s655_s18, 1  ;;  %s665_s22 = smov (!%p199_p10), 96  }
   0xf   : > { %202 = sbr.rel (%p199_p10) target bundleno = 427 (0x1ab), region = 36  ;;  %s666_s5 = smov (!%p199_p10), 64  }
  0x10   : > { %s230_s6 = sand.u32 (!%p199_p10), 1, %s647_s16   ;;  %s515_s8 = sshll.u32 (!%p199_p10), %s655_s18, 3 }
  0x11   : > { %s375_s11 = scalar_lea.hbm (!%p199_p10), %s815_s4, %s515_s8  ;;  %s605_s29 = scalar_lea.hbm (!%p199_p10), %s815_s4, 16 }
  0x12   : > { %s379_s14 = sshll.u32 (!%p199_p10), %s375_s11, 4  ;;  %s380_s14 = int_to_ptr.hbm [resolvable:$true] %s379_s14 }
  0x14   : > { %v519_v0 = vld [vmem:[%s812_s1 + $0x8] sm:$0xff]  ;;  %s234_s7 = scalar_select %p233_p11, %s655_s18, 1  ;;  %v518_v2 = vld [vmem:[%s812_s1] sm:$0xff]  ;;  %vm274_vm0 = vcmask 261120  }
  0x15   : > { %v521_v1 = vld [vmem:[%s813_s2 + $0x8] sm:$0xff]  ;;  %312 = vmatpush.bf16.msra.mxu1 %v519_v0  ;;  %v520_v3 = vld [vmem:[%s813_s2] sm:$0xff]  ;;  %s364_s18 = scalar_lea.sflag [#allocation3], %s230_s6 }
  0x16   : > { %284 = vmatpush.bf16.msra.mxu0 %v521_v1  ;;  %s486_s12 = sshll.u32 %s234_s7, 2  ;;  %v523_v10 = vld [vmem:[%s814_s3 + $0x8] sm:$0xff]  ;;  %v522_v11 = vld [vmem:[%s814_s3] sm:$0xff]  ;;  %s485_s7 = sshll.u32 %s230_s6, 3 }
  0x17   : > { %s236_s21 = scalar_lea.vmem %s811_s0, %s486_s12  ;;  %347 = vmatpush.bf16.msra.mxu2 %v523_v10  ;;  %s232_s12 = scalar_lea.vmem [#allocation2], %s485_s7 }
  0x18   : > { %v248_v4 = vld [vmem:[%s236_s21] sm:$0xf]  ;;  %s377_s13 = sshll.u32 %s232_s12, 4  ;;  %s599_s21 = sshra.s32 %s380_s14, 4  ;;  %s378_s13 = int_to_ptr.vmem [resolvable:$true] %s377_s13  ;;  %s600_s21 = int_to_ptr.hbm [resolvable:$true] %s599_s21 }
  0x19   : > { %313 = vmatpush.bf16.msra.mxu1 %v518_v2  ;;  %v258_v5 = vunpack.c.l.b16 %v248_v4  ;;  %v354_v12 = vunpack.c.l.bf16 %v248_v4  ;;  %p606_p1 = scmp.lt.s32.totalorder %s600_s21, %s815_s4 }
  0x1a   : > { %285 = vmatpush.bf16.msra.mxu0 %v520_v3 }
  0x1b   : > { %v259_v6 = vpack.c.b16 %v258_v5, %v258_v5  ;;  %348 = vmatpush.bf16.msra.mxu2 %v522_v11 }
  0x1c   : > { %504 = vmatmul.msk.bf16.vlgmr.msra.gmra.mxu1 %vm274_vm0, %v248_v4 }
  0x1d   : > { %260 = vrot.lane.b32.xlu0 %v259_v6, %s665_s22  ;;  %s601_s22 = scalar_lea.hbm %s600_s21, 8 }
  0x1e   : > { %p602_p12 = scmp.ne.s32.totalorder %s600_s21, %s601_s22  ;;  %p607_p2 = scmp.lt.s32.totalorder %s605_s29, %s601_s22 }
  0x20   : > { %p603_p13 = pnand %p602_p12, %p732_p4  ;;  %p608_p3 = por %p607_p2, %p606_p1 }
  0x22   : > { %p604_p0 = pneg %p603_p13 }
  0x24   : > { %p609_p5 = pnand %p608_p3, %p604_p0 }
  0x25   : > { %356 = vrot.lane.b32.xlu0 %v354_v12, %s666_s5 }
  0x8f   : > { %v261_v7 = vpop.permute.xlu0 %260 }
  0x90   : > { %495 = vmatmul.msk.bf16.vlgmr.msra.gmra.mxu0 %vm274_vm0, %v261_v7 }
  0x97   : > { %v357_v20 = vpop.permute.xlu0 %356 }
  0x99   : > { %v315_v8 = vpop.f32.mrf.mxu1 }
  0xa1   : > { %v317_v9 = vpop.f32.mrf.mxu1 }
 0x10d   : > { %v287_v13 = vpop.f32.mrf.mxu0 }
 0x10e   : > { %v316_v14 = vadd.f32 %v315_v8, %v287_v13 }
 0x110   : > { %v319_v15 = vmul.f32 1.442695, %v316_v14 }
 0x112   : > { %581 = vpow2.f32 %v319_v15 }
 0x115   : > { %v289_v16 = vpop.f32.mrf.mxu0 }
 0x118   : > { %v582_v17 = vpop.eup %581 }
 0x119   : > { %v321_v18 = vpack.c.bf16 %v582_v17, %v582_v17 }
 0x11b   : > { %513 = vmatmul.msk.bf16.vlgmr.msra.gmra.mxu2 %vm274_vm0, %v321_v18 }
 0x19e   : > { %v350_v19 = vpop.f32.mrf.mxu2 }
 0x19f   : > { %583 = vrcp.f32 %v350_v19  ;;  %v359_v21 = vmul.f32 %v357_v20, %v350_v19 }
 0x1a5   : > { %v584_v22 = vpop.eup %583 }
 0x1a6   : > { %v361_v23 = vmul.f32 %v584_v22, %v359_v21  ;;  %v352_v24 = vpop.f32.mrf.mxu2 }
 0x1a8   : > { %362 = vst.msk [vmem:[%s232_s12] sm:$0xff] %vm274_vm0, %v361_v23 }
 0x1a9   : > { %612 = shalt.err (!%p609_p5)
}
 0x1aa   : > { %524 = dma.vmem_to_hbm [thread:$0]  (%p732_p4), %s378_s13, 128, %s380_s14, %s364_s18  }
 0x1ab PF: > { %p530_p6 = scmp.ge.s32.totalorder %s663_s20, 2  ;;  %s391_s6 = sand.u32 1, %s643_s15  }
 0x1ac   : > { %s392_s7 = scalar_lea.sflag [#allocation3], %s391_s6 }
 0x1ad   : > { %p527_p7 = pnand %p530_p6, %p739_p8 }
 0x1af   : > { %p528_p9 = pneg %p527_p7 }
 0x1b1   : > { %638 = dma.done.wait (%p528_p9), %s392_s7, 128  }
 0x1b2   : > { %640 = vsyncadd (%p528_p9), %s392_s7, 4294967168  ;;  %s17_s20 = sadd.s32 1, %s663_s20   ;;  %s818_s15 = smov %s647_s16 }
 0x1b3   : > { %p14_p10 = scmp.ge.s32.totalorder %s17_s20, 4   ;;  %s819_s16 = smov %s651_s17 }
 0x1b4   : > { %s820_s17 = smov %s745_s28  ;;  %s821_s18 = smov %s659_s19 }
 0x1b5   : > { %s822_s19 = smov %s824_s23  ;;  %16 = sbr.rel (!%p14_p10) target bundleno = 4 (0x4), region = 77 }
 0x1ba   :  { %398 = vsyncpa [#allocation3], 1 }
 0x1bb   :  { %400 = vsyncpa [#allocation3 + $0x1], 1 }

</bundles_post_ra>
